<compile_context>
chip_gen: v7x
topology: tpu7x:2x2x1
jax: 0.10.0
libtpu: 0.0.40
codegen_flags: <defaults>
</compile_context>

<pallas_src>
import functools

import jax
import jax.numpy as jnp
from jax import lax
from jax.experimental import pallas as pl
from jax.experimental.pallas import tpu as pltpu

EPS = 1e-5    # PyTorch InstanceNorm2d default eps (affine=False, no running stats)
LPAD = 128    # left zero-pad (lanes) of the flattened spatial axis; >= W+1, 128-aligned
RPAD = 128    # right zero-pad; >= W+1


def _resnet_block_kernel(x_ref, w_ref, o_ref, pad_ref, *, H, W, C):
    """One sample per grid step.

    x_ref  : (1, C, H*W)            input sample, spatial flattened on lanes
    w_ref  : (9, C, C)              per-tap (C_out, C_in) weights, tap = kh*3+kw
    o_ref  : (1, C, H*W)            output (lane-dense)
    pad_ref: (C, LPAD+H*W+RPAD)     VMEM scratch: zero-padded flat spatial row
    """
    HW = H * W
    x = x_ref[0]                                            # (C, HW) f32

    # Build the zero-padded flat row in VMEM. The pad regions absorb vertically
    # out-of-range taps; all three stores are lane-aligned (LPAD % 128 == 0).
    # (Re-zeroed per step: cheap, and safe under megacore grid sharding.)
    pad_ref[:, :LPAD] = jnp.zeros((C, LPAD), jnp.float32)
    pad_ref[:, LPAD + HW:] = jnp.zeros((C, RPAD), jnp.float32)
    pad_ref[:, LPAD:LPAD + HW] = x

    # Column-validity masks for the horizontal taps (reading w-1 / w+1).
    col = lax.broadcasted_iota(jnp.int32, (1, HW), 1) % W
    ok_l = col >= 1            # valid when the tap reads w-1
    ok_r = col <= W - 2        # valid when the tap reads w+1

    # 3x3 conv: 9 shifted windows of the padded row, each a (C,C)@(C,HW) matmul.
    # Grouped by kw so only one select per horizontal-boundary group is needed
    # (masking the group's output columns == masking its input columns).
    acc = jnp.zeros((C, HW), jnp.float32)
    for kw in range(3):
        dw = kw - 1
        acc_w = jnp.zeros((C, HW), jnp.float32)
        for kh in range(3):
            dh = kh - 1
            s = dh * W + dw                                  # static flat shift
            patch = pad_ref[:, LPAD + s:LPAD + s + HW]       # (C_in, HW)
            acc_w = acc_w + jnp.dot(w_ref[kh * 3 + kw], patch,
                                    preferred_element_type=jnp.float32)
        if dw == -1:
            acc_w = jnp.where(ok_l, acc_w, 0.0)
        elif dw == 1:
            acc_w = jnp.where(ok_r, acc_w, 0.0)
        acc = acc + acc_w

    # InstanceNorm2d (affine=False, biased variance) -- lane-axis reduction.
    mean = jnp.mean(acc, axis=1, keepdims=True)
    cen = acc - mean
    var = jnp.mean(cen * cen, axis=1, keepdims=True)
    y = jnp.maximum(cen * lax.rsqrt(var + EPS), 0.0)         # ReLU
    o_ref[0] = (x + y).astype(o_ref.dtype)                   # residual add


def resnet_block(x_nchw, w_oihw):
    """x_nchw: (N, C, H, W) like PyTorch; w_oihw: (C, C, 3, 3) Conv2d weight."""
    N, C, H, W = x_nchw.shape
    HW = H * W
    assert W + 1 <= LPAD and W + 1 <= RPAD, "spatial width too large for fixed pad"

    # Wrapper relayouts are free contiguous reshapes only (no transpose / pad of
    # the activation). Weight repack is 9*C*C floats -> negligible, fetched once.
    x_flat = x_nchw.reshape(N, C, HW).astype(jnp.float32)
    w_taps = jnp.transpose(w_oihw.astype(jnp.float32), (2, 3, 0, 1)).reshape(9, C, C)

    out_flat = pl.pallas_call(
        functools.partial(_resnet_block_kernel, H=H, W=W, C=C),
        out_shape=jax.ShapeDtypeStruct((N, C, HW), jnp.float32),
        grid=(N,),
        in_specs=[pl.BlockSpec((1, C, HW), lambda n: (n, 0, 0)),
                  pl.BlockSpec((9, C, C), lambda n: (0, 0, 0))],
        out_specs=pl.BlockSpec((1, C, HW), lambda n: (n, 0, 0)),
        scratch_shapes=[pltpu.VMEM((C, LPAD + HW + RPAD), jnp.float32)],
        compiler_params=pltpu.CompilerParams(
            dimension_semantics=("parallel",)),
    )(x_flat, w_taps)

    return out_flat.reshape(N, C, H, W)   # free reshape back to NCHW


def _reference(x, w):
    """Pure-JAX reference matching the PyTorch forward semantics (NCHW)."""
    y = lax.conv_general_dilated(x, w, (1, 1), "SAME",
                                 dimension_numbers=("NCHW", "OIHW", "NCHW"))
    mean = jnp.mean(y, axis=(2, 3), keepdims=True)
    var = jnp.mean((y - mean) ** 2, axis=(2, 3), keepdims=True)
    y = jnp.maximum((y - mean) * lax.rsqrt(var + EPS), 0.0)
    return x + y


if __name__ == "__main__":
    key = jax.random.PRNGKey(0)
    kx, kw = jax.random.split(key)
    N, C, H, W = 2, 4, 16, 16  # conv_dim = 4
    x = jax.random.normal(kx, (N, C, H, W), jnp.float32)
    # Conv2d(conv_dim, conv_dim, 3) weight (out, in, 3, 3); bias=False since norm set.
    w = 0.05 * jax.random.normal(kw, (C, C, 3, 3), jnp.float32)

    out = jax.block_until_ready(resnet_block(x, w))
    assert out.shape == (N, C, H, W)
    ref = _reference(x, w)
    err = float(jnp.max(jnp.abs(out - ref)))
    assert jnp.allclose(out, ref, atol=1e-4, rtol=1e-4), err
    print("KERNEL_OK")
</pallas_src>

<mosaic_0001>
module attributes {stable_mosaic.version = 11 : i64} {
  func.func @_resnet_block_kernel(%arg0: i32, %arg1: memref<1x4x256xf32, #tpu.memory_space<vmem>>, %arg2: memref<9x4x4xf32, #tpu.memory_space<vmem>>, %arg3: memref<1x4x256xf32, #tpu.memory_space<vmem>>, %arg4: memref<4x512xf32, #tpu.memory_space<vmem>>) attributes {dimension_semantics = [#tpu.dimension_semantics<parallel>], iteration_bounds = array<i64: 2>, scalar_prefetch = 0 : i64, scratch_operands = 1 : i64, tpu.core_type = #tpu.core_type<tc>, window_params = [{transform_indices = @transform_0, window_bounds = array<i64: 1, 4, 256>}, {pipeline_mode = #tpu.pipeline_mode<synchronous>, transform_indices = @transform_1, window_bounds = array<i64: 9, 4, 4>}, {transform_indices = @transform_2, window_bounds = array<i64: 1, 4, 256>}]} {
    %c0 = arith.constant 0 : index
    %c0_0 = arith.constant 0 : index
    %c0_1 = arith.constant 0 : index
    %0 = vector.load %arg1[%c0, %c0_0, %c0_1] : memref<1x4x256xf32, #tpu.memory_space<vmem>>, vector<1x4x256xf32>
    %1 = vector.shape_cast %0 : vector<1x4x256xf32> to vector<4x256xf32>
    %cst = arith.constant 0.000000e+00 : f32
    %2 = vector.broadcast %cst : f32 to vector<4x128xf32>
    %c0_2 = arith.constant 0 : index
    %c0_3 = arith.constant 0 : index
    %3 = vector.load %arg4[%c0_2, %c0_3] : memref<4x512xf32, #tpu.memory_space<vmem>>, vector<4x128xf32>
    tpu.vector_store %arg4[%c0_2, %c0_3], %2 {strides = array<i32>} : memref<4x512xf32, #tpu.memory_space<vmem>>, vector<4x128xf32>,
    %cst_4 = arith.constant 0.000000e+00 : f32
    %4 = vector.broadcast %cst_4 : f32 to vector<4x128xf32>
    %c0_5 = arith.constant 0 : index
    %c384 = arith.constant 384 : index
    %5 = vector.load %arg4[%c0_5, %c384] : memref<4x512xf32, #tpu.memory_space<vmem>>, vector<4x128xf32>
    tpu.vector_store %arg4[%c0_5, %c384], %4 {strides = array<i32>} : memref<4x512xf32, #tpu.memory_space<vmem>>, vector<4x128xf32>,
    %c0_6 = arith.constant 0 : index
    %c128 = arith.constant 128 : index
    %6 = vector.load %arg4[%c0_6, %c128] : memref<4x512xf32, #tpu.memory_space<vmem>>, vector<4x256xf32>
    tpu.vector_store %arg4[%c0_6, %c128], %1 {strides = array<i32>} : memref<4x512xf32, #tpu.memory_space<vmem>>, vector<4x256xf32>,
    %7 = tpu.iota {dimensions = array<i32: 1>} : vector<1x256xi32>
    %c16_i32 = arith.constant 16 : i32
    %c0_i32 = arith.constant 0 : i32
    %8 = arith.cmpi eq, %c16_i32, %c0_i32 : i32
    %c1_i32 = arith.constant 1 : i32
    %9 = arith.select %8, %c1_i32, %c16_i32 : i32
    %10 = vector.broadcast %9 : i32 to vector<1x256xi32>
    %11 = arith.remsi %7, %10 : vector<1x256xi32>
    %c0_i32_7 = arith.constant 0 : i32
    %12 = vector.broadcast %c0_i32_7 : i32 to vector<1x256xi32>
    %13 = arith.cmpi ne, %11, %12 : vector<1x256xi32>
    %c0_i32_8 = arith.constant 0 : i32
    %14 = vector.broadcast %c0_i32_8 : i32 to vector<1x256xi32>
    %15 = arith.cmpi slt, %11, %14 : vector<1x256xi32>
    %c0_i32_9 = arith.constant 0 : i32
    %16 = arith.cmpi slt, %9, %c0_i32_9 : i32
    %17 = vector.broadcast %16 : i1 to vector<1x256xi1>
    %18 = vector.broadcast %17 : vector<1x256xi1> to vector<1x256xi1>
    %19 = arith.xori %15, %18 : vector<1x256xi1>
    %20 = arith.andi %19, %13 : vector<1x256xi1>
    %21 = vector.broadcast %9 : i32 to vector<1x256xi32>
    %22 = arith.addi %11, %21 : vector<1x256xi32>
    %23 = arith.select %20, %22, %11 : vector<1x256xi1>, vector<1x256xi32>
    %c1_i32_10 = arith.constant 1 : i32
    %24 = vector.broadcast %c1_i32_10 : i32 to vector<1x256xi32>
    %25 = arith.cmpi sge, %23, %24 : vector<1x256xi32>
    %c14_i32 = arith.constant 14 : i32
    %26 = vector.broadcast %c14_i32 : i32 to vector<1x256xi32>
    %27 = arith.cmpi sle, %23, %26 : vector<1x256xi32>
    %cst_11 = arith.constant 0.000000e+00 : f32
    %28 = vector.broadcast %cst_11 : f32 to vector<4x256xf32>
    %cst_12 = arith.constant 0.000000e+00 : f32
    %29 = vector.broadcast %cst_12 : f32 to vector<4x256xf32>
    %c0_13 = arith.constant 0 : index
    %c111 = arith.constant 111 : index
    %30 = vector.load %arg4[%c0_13, %c111] : memref<4x512xf32, #tpu.memory_space<vmem>>, vector<4x256xf32>
    %c0_14 = arith.constant 0 : index
    %c0_15 = arith.constant 0 : index
    %c0_16 = arith.constant 0 : index
    %31 = vector.load %arg2[%c0_14, %c0_15, %c0_16] : memref<9x4x4xf32, #tpu.memory_space<vmem>>, vector<1x4x4xf32>
    %32 = vector.shape_cast %31 : vector<1x4x4xf32> to vector<4x4xf32>
    %cst_17 = arith.constant dense<0.000000e+00> : vector<4x256xf32>
    %33 = tpu.matmul %32, %30, %cst_17 {dimension_numbers = #tpu.dot_dimension_numbers<[1], [0], [0], [1], [0, 0, 1, 1], [], []>} : vector<4x4xf32>, vector<4x256xf32>, vector<4x256xf32> -> vector<4x256xf32>
    %34 = arith.addf %29, %33 : vector<4x256xf32>
    %c0_18 = arith.constant 0 : index
    %c127 = arith.constant 127 : index
    %35 = vector.load %arg4[%c0_18, %c127] : memref<4x512xf32, #tpu.memory_space<vmem>>, vector<4x256xf32>
    %c3 = arith.constant 3 : index
    %c0_19 = arith.constant 0 : index
    %c0_20 = arith.constant 0 : index
    %36 = vector.load %arg2[%c3, %c0_19, %c0_20] : memref<9x4x4xf32, #tpu.memory_space<vmem>>, vector<1x4x4xf32>
    %37 = vector.shape_cast %36 : vector<1x4x4xf32> to vector<4x4xf32>
    %cst_21 = arith.constant dense<0.000000e+00> : vector<4x256xf32>
    %38 = tpu.matmul %37, %35, %cst_21 {dimension_numbers = #tpu.dot_dimension_numbers<[1], [0], [0], [1], [0, 0, 1, 1], [], []>} : vector<4x4xf32>, vector<4x256xf32>, vector<4x256xf32> -> vector<4x256xf32>
    %39 = arith.addf %34, %38 : vector<4x256xf32>
    %c0_22 = arith.constant 0 : index
    %c143 = arith.constant 143 : index
    %40 = vector.load %arg4[%c0_22, %c143] : memref<4x512xf32, #tpu.memory_space<vmem>>, vector<4x256xf32>
    %c6 = arith.constant 6 : index
    %c0_23 = arith.constant 0 : index
    %c0_24 = arith.constant 0 : index
    %41 = vector.load %arg2[%c6, %c0_23, %c0_24] : memref<9x4x4xf32, #tpu.memory_space<vmem>>, vector<1x4x4xf32>
    %42 = vector.shape_cast %41 : vector<1x4x4xf32> to vector<4x4xf32>
    %cst_25 = arith.constant dense<0.000000e+00> : vector<4x256xf32>
    %43 = tpu.matmul %42, %40, %cst_25 {dimension_numbers = #tpu.dot_dimension_numbers<[1], [0], [0], [1], [0, 0, 1, 1], [], []>} : vector<4x4xf32>, vector<4x256xf32>, vector<4x256xf32> -> vector<4x256xf32>
    %44 = arith.addf %39, %43 : vector<4x256xf32>
    %cst_26 = arith.constant 0.000000e+00 : f32
    %45 = vector.shape_cast %25 : vector<1x256xi1> to vector<1x256xi1>
    %46 = vector.broadcast %45 : vector<1x256xi1> to vector<4x256xi1>
    %47 = vector.broadcast %cst_26 : f32 to vector<4x256xf32>
    %48 = arith.select %46, %44, %47 : vector<4x256xi1>, vector<4x256xf32>
    %49 = arith.addf %28, %48 : vector<4x256xf32>
    %cst_27 = arith.constant 0.000000e+00 : f32
    %50 = vector.broadcast %cst_27 : f32 to vector<4x256xf32>
    %c0_28 = arith.constant 0 : index
    %c112 = arith.constant 112 : index
    %51 = vector.load %arg4[%c0_28, %c112] : memref<4x512xf32, #tpu.memory_space<vmem>>, vector<4x256xf32>
    %c1 = arith.constant 1 : index
    %c0_29 = arith.constant 0 : index
    %c0_30 = arith.constant 0 : index
    %52 = vector.load %arg2[%c1, %c0_29, %c0_30] : memref<9x4x4xf32, #tpu.memory_space<vmem>>, vector<1x4x4xf32>
    %53 = vector.shape_cast %52 : vector<1x4x4xf32> to vector<4x4xf32>
    %cst_31 = arith.constant dense<0.000000e+00> : vector<4x256xf32>
    %54 = tpu.matmul %53, %51, %cst_31 {dimension_numbers = #tpu.dot_dimension_numbers<[1], [0], [0], [1], [0, 0, 1, 1], [], []>} : vector<4x4xf32>, vector<4x256xf32>, vector<4x256xf32> -> vector<4x256xf32>
    %55 = arith.addf %50, %54 : vector<4x256xf32>
    %c0_32 = arith.constant 0 : index
    %c128_33 = arith.constant 128 : index
    %56 = vector.load %arg4[%c0_32, %c128_33] : memref<4x512xf32, #tpu.memory_space<vmem>>, vector<4x256xf32>
    %c4 = arith.constant 4 : index
    %c0_34 = arith.constant 0 : index
    %c0_35 = arith.constant 0 : index
    %57 = vector.load %arg2[%c4, %c0_34, %c0_35] : memref<9x4x4xf32, #tpu.memory_space<vmem>>, vector<1x4x4xf32>
    %58 = vector.shape_cast %57 : vector<1x4x4xf32> to vector<4x4xf32>
    %cst_36 = arith.constant dense<0.000000e+00> : vector<4x256xf32>
    %59 = tpu.matmul %58, %56, %cst_36 {dimension_numbers = #tpu.dot_dimension_numbers<[1], [0], [0], [1], [0, 0, 1, 1], [], []>} : vector<4x4xf32>, vector<4x256xf32>, vector<4x256xf32> -> vector<4x256xf32>
    %60 = arith.addf %55, %59 : vector<4x256xf32>
    %c0_37 = arith.constant 0 : index
    %c144 = arith.constant 144 : index
    %61 = vector.load %arg4[%c0_37, %c144] : memref<4x512xf32, #tpu.memory_space<vmem>>, vector<4x256xf32>
    %c7 = arith.constant 7 : index
    %c0_38 = arith.constant 0 : index
    %c0_39 = arith.constant 0 : index
    %62 = vector.load %arg2[%c7, %c0_38, %c0_39] : memref<9x4x4xf32, #tpu.memory_space<vmem>>, vector<1x4x4xf32>
    %63 = vector.shape_cast %62 : vector<1x4x4xf32> to vector<4x4xf32>
    %cst_40 = arith.constant dense<0.000000e+00> : vector<4x256xf32>
    %64 = tpu.matmul %63, %61, %cst_40 {dimension_numbers = #tpu.dot_dimension_numbers<[1], [0], [0], [1], [0, 0, 1, 1], [], []>} : vector<4x4xf32>, vector<4x256xf32>, vector<4x256xf32> -> vector<4x256xf32>
    %65 = arith.addf %60, %64 : vector<4x256xf32>
    %66 = arith.addf %49, %65 : vector<4x256xf32>
    %cst_41 = arith.constant 0.000000e+00 : f32
    %67 = vector.broadcast %cst_41 : f32 to vector<4x256xf32>
    %c0_42 = arith.constant 0 : index
    %c113 = arith.constant 113 : index
    %68 = vector.load %arg4[%c0_42, %c113] : memref<4x512xf32, #tpu.memory_space<vmem>>, vector<4x256xf32>
    %c2 = arith.constant 2 : index
    %c0_43 = arith.constant 0 : index
    %c0_44 = arith.constant 0 : index
    %69 = vector.load %arg2[%c2, %c0_43, %c0_44] : memref<9x4x4xf32, #tpu.memory_space<vmem>>, vector<1x4x4xf32>
    %70 = vector.shape_cast %69 : vector<1x4x4xf32> to vector<4x4xf32>
    %cst_45 = arith.constant dense<0.000000e+00> : vector<4x256xf32>
    %71 = tpu.matmul %70, %68, %cst_45 {dimension_numbers = #tpu.dot_dimension_numbers<[1], [0], [0], [1], [0, 0, 1, 1], [], []>} : vector<4x4xf32>, vector<4x256xf32>, vector<4x256xf32> -> vector<4x256xf32>
    %72 = arith.addf %67, %71 : vector<4x256xf32>
    %c0_46 = arith.constant 0 : index
    %c129 = arith.constant 129 : index
    %73 = vector.load %arg4[%c0_46, %c129] : memref<4x512xf32, #tpu.memory_space<vmem>>, vector<4x256xf32>
    %c5 = arith.constant 5 : index
    %c0_47 = arith.constant 0 : index
    %c0_48 = arith.constant 0 : index
    %74 = vector.load %arg2[%c5, %c0_47, %c0_48] : memref<9x4x4xf32, #tpu.memory_space<vmem>>, vector<1x4x4xf32>
    %75 = vector.shape_cast %74 : vector<1x4x4xf32> to vector<4x4xf32>
    %cst_49 = arith.constant dense<0.000000e+00> : vector<4x256xf32>
    %76 = tpu.matmul %75, %73, %cst_49 {dimension_numbers = #tpu.dot_dimension_numbers<[1], [0], [0], [1], [0, 0, 1, 1], [], []>} : vector<4x4xf32>, vector<4x256xf32>, vector<4x256xf32> -> vector<4x256xf32>
    %77 = arith.addf %72, %76 : vector<4x256xf32>
    %c0_50 = arith.constant 0 : index
    %c145 = arith.constant 145 : index
    %78 = vector.load %arg4[%c0_50, %c145] : memref<4x512xf32, #tpu.memory_space<vmem>>, vector<4x256xf32>
    %c8 = arith.constant 8 : index
    %c0_51 = arith.constant 0 : index
    %c0_52 = arith.constant 0 : index
    %79 = vector.load %arg2[%c8, %c0_51, %c0_52] : memref<9x4x4xf32, #tpu.memory_space<vmem>>, vector<1x4x4xf32>
    %80 = vector.shape_cast %79 : vector<1x4x4xf32> to vector<4x4xf32>
    %cst_53 = arith.constant dense<0.000000e+00> : vector<4x256xf32>
    %81 = tpu.matmul %80, %78, %cst_53 {dimension_numbers = #tpu.dot_dimension_numbers<[1], [0], [0], [1], [0, 0, 1, 1], [], []>} : vector<4x4xf32>, vector<4x256xf32>, vector<4x256xf32> -> vector<4x256xf32>
    %82 = arith.addf %77, %81 : vector<4x256xf32>
    %cst_54 = arith.constant 0.000000e+00 : f32
    %83 = vector.shape_cast %27 : vector<1x256xi1> to vector<1x256xi1>
    %84 = vector.broadcast %83 : vector<1x256xi1> to vector<4x256xi1>
    %85 = vector.broadcast %cst_54 : f32 to vector<4x256xf32>
    %86 = arith.select %84, %82, %85 : vector<4x256xi1>, vector<4x256xf32>
    %87 = arith.addf %66, %86 : vector<4x256xf32>
    %cst_55 = arith.constant dense<0.000000e+00> : vector<4xf32>
    %88 = vector.multi_reduction <add>, %87, %cst_55 [1] : vector<4x256xf32> to vector<4xf32>
    %89 = vector.shape_cast %88 : vector<4xf32> to vector<4x1xf32>
    %cst_56 = arith.constant 2.560000e+02 : f32
    %90 = vector.broadcast %cst_56 : f32 to vector<4x1xf32>
    %91 = arith.divf %89, %90 : vector<4x1xf32>
    %92 = vector.broadcast %91 : vector<4x1xf32> to vector<4x256xf32>
    %93 = arith.subf %87, %92 : vector<4x256xf32>
    %94 = arith.mulf %93, %93 : vector<4x256xf32>
    %cst_57 = arith.constant dense<0.000000e+00> : vector<4xf32>
    %95 = vector.multi_reduction <add>, %94, %cst_57 [1] : vector<4x256xf32> to vector<4xf32>
    %96 = vector.shape_cast %95 : vector<4xf32> to vector<4x1xf32>
    %cst_58 = arith.constant 2.560000e+02 : f32
    %97 = vector.broadcast %cst_58 : f32 to vector<4x1xf32>
    %98 = arith.divf %96, %97 : vector<4x1xf32>
    %cst_59 = arith.constant 9.99999974E-6 : f32
    %99 = vector.broadcast %cst_59 : f32 to vector<4x1xf32>
    %100 = arith.addf %98, %99 : vector<4x1xf32>
    %101 = math.rsqrt %100 : vector<4x1xf32>
    %102 = vector.broadcast %101 : vector<4x1xf32> to vector<4x256xf32>
    %103 = arith.mulf %93, %102 : vector<4x256xf32>
    %cst_60 = arith.constant 0.000000e+00 : f32
    %104 = vector.broadcast %cst_60 : f32 to vector<4x256xf32>
    %105 = arith.maximumf %103, %104 : vector<4x256xf32>
    %106 = arith.addf %1, %105 : vector<4x256xf32>
    %c0_61 = arith.constant 0 : index
    %c0_62 = arith.constant 0 : index
    %c0_63 = arith.constant 0 : index
    %107 = vector.load %arg3[%c0_61, %c0_62, %c0_63] : memref<1x4x256xf32, #tpu.memory_space<vmem>>, vector<1x4x256xf32>
    %108 = vector.shape_cast %107 : vector<1x4x256xf32> to vector<4x256xf32>
    %109 = vector.shape_cast %106 : vector<4x256xf32> to vector<1x4x256xf32>
    tpu.vector_store %arg3[%c0_61, %c0_62, %c0_63], %109 {strides = array<i32>} : memref<1x4x256xf32, #tpu.memory_space<vmem>>, vector<1x4x256xf32>,
    return
  }
  func.func @transform_0(%arg0: i32) -> (i32, i32, i32) {
    %c0_i32 = arith.constant 0 : i32
    %c0_i32_0 = arith.constant 0 : i32
    %c0_i32_1 = arith.constant 0 : i32
    return %arg0, %c0_i32, %c0_i32_0 : i32, i32, i32
  }
  func.func @transform_1(%arg0: i32) -> (i32, i32, i32) {
    %c0_i32 = arith.constant 0 : i32
    %c0_i32_0 = arith.constant 0 : i32
    %c0_i32_1 = arith.constant 0 : i32
    %c0_i32_2 = arith.constant 0 : i32
    return %c0_i32, %c0_i32_0, %c0_i32_1 : i32, i32, i32
  }
  func.func @transform_2(%arg0: i32) -> (i32, i32, i32) {
    %c0_i32 = arith.constant 0 : i32
    %c0_i32_0 = arith.constant 0 : i32
    %c0_i32_1 = arith.constant 0 : i32
    return %arg0, %c0_i32, %c0_i32_0 : i32, i32, i32
  }
}

</mosaic_0001>

<bundles_post_ra>
// kernel: tpu_custom_call.1
= control target key start
LH: loop header
LB: loop body
LE: loop exit
PB: predicated region body
PF: predicated region fallthrough
CT: control target
= control target key end

     0   :  { %7 = vsyncpa [#allocation4], 0  ;;  %s1517_s0 = inlined_call_operand.vmem [shape: f32[2,4,256], index: 0, kind: input, shape index: {}]   ;;  %s1518_s1 = inlined_call_operand.vmem [shape: f32[9,4,4], index: 1, kind: input, shape index: {}]   ;;  %s1519_s2 = inlined_call_operand.hbm [shape: f32[2,4,256], index: 2, kind: output, shape index: {}]  }
   0x1   :  { %9 = vsyncpa [#allocation4 + $0x1], 0  ;;  %s1337_s9 = smov 0   ;;  %s1339_s10 = smov 0  }
   0x2   :  { %s1341_s11 = smov 0   ;;  %s1343_s12 = smov 0  }
   0x3 LB: > { %s1358_s13 = sadd.s32 4294967295, %s1310_s12   ;;  %s1135_s14 = sadd.s32 4294967294, %s1310_s12   ;;  %s1310_s12 = sphi %s1343_s12, %s1525_s12   ;;  %s1306_s11 = sphi %s1341_s11, %s1524_s11   ;;  %s1302_s10 = sphi %s1339_s10, %s1523_s10   ;;  %s1298_s9 = sphi %s1337_s9, %s1522_s9  }
   0x4   : > { %s1362_s15 = sadd.s32 1, %s1310_s12   ;;  %s69_s16 = sadd.s32 1, %s1306_s11 }
   0x5   : > { %s66_s17 = ssub.s32 %s1310_s12, %s1362_s15  ;;  %p79_p0 = scmp.ne.s32.totalorder %s1306_s11, %s1302_s10 }
   0x6   : > { %p67_p1 = scmp.eq.s32.totalorder %s66_s17, 0  ;;  %p80_p2 = scmp.eq.s32.totalorder %s1358_s13, 1 }
   0x7   : > { %p85_p3 = scmp.ne.s32.totalorder %s1302_s10, %s1298_s9  ;;  %p86_p4 = scmp.eq.s32.totalorder %s1135_s14, 1 }
   0x8   : > { %s1373_s18 = scalar_select %p67_p1, %s1306_s11, %s69_s16  }
   0x9   : > { %p1375_p5 = por %p80_p2, %p79_p0  ;;  %p1379_p6 = por %p86_p4, %p85_p3 }
   0xa   : > { %p1138_p7 = scmp.ge.s32.totalorder %s1310_s12, 1  ;;  %p115_p8 = scmp.lt.s32.totalorder %s1310_s12, 3 }
   0xc   : > { %p116_p9 = pnand %p1138_p7, %p115_p8 }
   0xd   : > { %p137_p10 = scmp.lt.s32.totalorder (!%p116_p9), %s1358_s13, 1  ;;  %v1312_v0 = vmov (!%p116_p9), 0.0   ;;  %s1313_s26 = smov (!%p116_p9), 113   ;;  %vm191_vm0 = vcmask (!%p116_p9), 7168   ;;  %vm198_vm1 = vcmask (!%p116_p9), 1043456   ;;  %vm280_vm2 = vcmask (!%p116_p9), 138240  }
   0xe   : > { %119 = sbr.rel (%p116_p9) target bundleno = 745 (0x2e9), region = 28  ;;  %144 = vst [vmem:[#allocation2 + $0xc] sm:$0xf] (!%p116_p9), %v1312_v0  ;;  %143 = vst [vmem:[#allocation2] sm:$0xf] (!%p116_p9), %v1312_v0  ;;  %354 = vmatprep.mubr.f32.mxu0 (!%p116_p9), %v1312_v0  ;;  %267 = vmatprep.mubr.f32.mxu1 (!%p116_p9), %v1312_v0  ;;  %s1314_s27 = smov (!%p116_p9), 17  }
   0xf   : > { %s1315_s28 = smov (!%p116_p9), 1   ;;  %s1316_s29 = smov (!%p116_p9), 127   ;;  %v1142_v21 = vld [vmem:[%s1518_s1 + $0xc] sm:$0xf] (!%p116_p9)  ;;  %vm194_vm3 = vcmask (!%p116_p9), 31744   ;;  %vm374_vm4 = vcmask (!%p116_p9), 924672  }
  0x10   : > { %s1317_s30 = smov (!%p116_p9), 16   ;;  %s1318_s3 = smov (!%p116_p9), 15   ;;  %v179_v26 = vld [vmem:[%s1518_s1] sm:$0xf] (!%p116_p9)  ;;  %v1154_v27 = vld [vmem:[%s1518_s1 + $0x10] sm:$0xf] (!%p116_p9) }
  0x11   : > { %s1319_s4 = smov (!%p116_p9), 112   ;;  %s1320_s5 = smov (!%p116_p9), 111   ;;  %vm757_vm5 = vcmask (!%p116_p9), 1039360   ;;  %v1149_v35 = vld [vmem:[%s1518_s1 + $0x18] sm:$0xf] (!%p116_p9)  ;;  %vm561_vm6 = vcmask (!%p116_p9), 130048  }
  0x12   : > { %v1166_v40 = vld [vmem:[%s1518_s1 + $0x14] sm:$0xf] (!%p116_p9)  ;;  %v1153_v43 = vld [vmem:[%s1518_s1 + $0x4] sm:$0xf] (!%p116_p9)  ;;  %vm847_vm7 = vcmask (!%p116_p9), 121856   ;;  %vm655_vm8 = vcmask (!%p116_p9), 916480  }
  0x13   : > { %v1165_v48 = vld [vmem:[%s1518_s1 + $0x8] sm:$0xf] (!%p116_p9)  ;;  %v1161_v54 = vld [vmem:[%s1518_s1 + $0x1c] sm:$0xf] (!%p116_p9)  ;;  %vm941_vm9 = vcmask (!%p116_p9), 908288   ;;  %s1183_s7 = sshll.u32 (!%p116_p9), %s1358_s13, 7 }
  0x14   : > { %v1173_v59 = vld [vmem:[%s1518_s1 + $0x20] sm:$0xf] (!%p116_p9) }
  0x15   : > { %s138_s21 = scalar_select %p137_p10, %s1358_s13, 1  ;;  %v362_v2 = vld [vmem:[#allocation2 + $0xc] sm:$0xf] }
  0x16   : > { %372 = vrot.lane.b32.xlu1 %v362_v2, %s1313_s26  ;;  %v745_v7 = vld [vmem:[#allocation2 + $0xc] sm:$0xf]  ;;  %s1321_s13 = smov [#allocation3]  }
  0x17   : > { %s1182_s22 = sshll.u32 %s138_s21, 3  ;;  %v643_v10 = vld [vmem:[#allocation2 + $0xc] sm:$0xf]  ;;  %s1475_s21 = scalar_lea.hbm %s1519_s2, %s1183_s7 }
  0x18   : > { %s141_s25 = scalar_lea.vmem %s1517_s0, %s1182_s22  ;;  %v929_v11 = vld [vmem:[#allocation2 + $0xc] sm:$0xf]  ;;  %s1252_s24 = sshll.u32 %s1321_s13, 4  ;;  %s1253_s24 = int_to_ptr.vmem [resolvable:$false] %s1252_s24 }
  0x19   : > { %v1394_v1 = vld [vmem:[%s141_s25] sm:$0xff]  ;;  %s1254_s25 = scalar_lea.vmem %s1253_s24, 256 }
  0x1a   : > { %145 = vst [vmem:[#allocation2 + $0x4] sm:$0xff] %v1394_v1  ;;  %v367_v6 = vcombine.high %v1394_v1, %v1394_v1 }
  0x21   : > { %v178_v3 = vld [vmem:[#allocation2 + $0x8] sm:$0xf]  ;;  %v177_v4 = vld [vmem:[#allocation2] sm:$0xff] }
  0x22   : > { %278 = vrot.lane.b32.xlu0 %v178_v3, %s1314_s27  ;;  %274 = vrot.lane.b32.xlu1 %v177_v4, %s1314_s27  ;;  %v184_v5 = vcombine.high %v177_v4, %v177_v4  ;;  %v466_v8 = vld [vmem:[#allocation2 + $0x8] sm:$0xf] }
  0x23   : > { %v741_v9 = vld [vmem:[#allocation2 + $0x8] sm:$0xf] }
  0x26   : > { %189 = vrot.lane.b32.xlu0 %v178_v3, %s1315_s28  ;;  %185 = vrot.lane.b32.xlu1 %v177_v4, %s1315_s28  ;;  %v146_v3 = vlaneseq }
  0x2a   : > { %368 = vrot.lane.b32.xlu0 %v1394_v1, %s1313_s26  ;;  %187 = vrot.lane.b32.xlu1 %v184_v5, %s1315_s28 }
  0x2e   : > { %276 = vrot.lane.b32.xlu0 %v184_v5, %s1314_s27  ;;  %753 = vrot.lane.b32.xlu1 %v367_v6, %s1316_s29 }
  0x32   : > { %370 = vrot.lane.b32.xlu0 %v367_v6, %s1313_s26  ;;  %751 = vrot.lane.b32.xlu1 %v1394_v1, %s1316_s29 }
  0x36   : > { %755 = vrot.lane.b32.xlu0 %v745_v7, %s1316_s29  ;;  %559 = vrot.lane.b32.xlu1 %v466_v8, %s1317_s30 }
  0x3a   : > { %557 = vrot.lane.b32.xlu0 %v184_v5, %s1317_s30  ;;  %843 = vrot.lane.b32.xlu1 %v184_v5, %s1318_s3  ;;  %v147_v5 = vand.u32 127, %v146_v3 }
  0x3c   : > { %v153_v7 = vand.u32 15, %v147_v5 }
  0x3e   : > { %555 = vrot.lane.b32.xlu0 %v177_v4, %s1317_s30  ;;  %841 = vrot.lane.b32.xlu1 %v177_v4, %s1318_s3  ;;  %vm173_vm10 = vcmp.ge.s32.totalorder %v153_v7, 1  ;;  %vm175_vm12 = vcmp.le.s32.totalorder %v153_v7, 14 }
  0x42   : > { %845 = vrot.lane.b32.xlu0 %v741_v9, %s1318_s3  ;;  %653 = vrot.lane.b32.xlu1 %v643_v10, %s1319_s4 }
  0x46   : > { %651 = vrot.lane.b32.xlu0 %v367_v6, %s1319_s4  ;;  %937 = vrot.lane.b32.xlu1 %v367_v6, %s1320_s5 }
  0x4a   : > { %649 = vrot.lane.b32.xlu0 %v1394_v1, %s1319_s4  ;;  %935 = vrot.lane.b32.xlu1 %v1394_v1, %s1320_s5 }
  0x4e   : > { %939 = vrot.lane.b32.xlu0 %v929_v11, %s1320_s5  ;;  %s134_s5 = sand.u32 1, %s1302_s10  }
  0x4f   : > { %s1139_s6 = sshll.u32 %s134_s5, 3  ;;  %s1062_s22 = scalar_lea.sflag [#allocation4], %s134_s5 }
  0x50   : > { %s136_s8 = scalar_lea.vmem [#allocation3], %s1139_s6 }
  0x51   : > { %s1076_s14 = sshll.u32 %s136_s8, 4  ;;  %s1477_s14 = int_to_ptr.vmem [resolvable:$true] %s1076_s14 }
  0x52   : > { %s1248_s23 = scalar_lea.vmem %s1477_s14, 128  ;;  %p1255_p0 = scmp.lt.s32.totalorder %s1477_s14, %s1253_s24 }
  0x53   : > { %p1249_p11 = scmp.ne.s32.totalorder %s1477_s14, %s1248_s23  ;;  %p1256_p1 = scmp.lt.s32.totalorder %s1254_s25, %s1248_s23 }
  0x55   : > { %p1250_p12 = pnand %p1249_p11, %p1375_p5  ;;  %p1257_p2 = por %p1256_p1, %p1255_p0 }
  0x57   : > { %p1251_p13 = pneg %p1250_p12 }
  0x59   : > { %p1258_p3 = pnand %p1257_p2, %p1251_p13 }
  0x88   : > { %v373_v12 = vpop.permute.xlu1 %372 }
  0x94   : > { %v279_v13 = vpop.permute.xlu0 %278  ;;  %v275_v14 = vpop.permute.xlu1 %274 }
  0x98   : > { %v190_v15 = vpop.permute.xlu0 %189  ;;  %v186_v16 = vpop.permute.xlu1 %185 }
  0x9c   : > { %v369_v17 = vpop.permute.xlu0 %368  ;;  %v188_v18 = vpop.permute.xlu1 %187 }
  0x9d   : > { %v193_v19 = vsel %vm191_vm0, %v188_v18, %v190_v15  ;;  %v192_v20 = vsel %vm191_vm0, %v186_v16, %v188_v18 }
  0x9e   : > { %1143 = vmatprep.subr.msk.mxu1 %vm198_vm1, %v193_v19 }
  0x9f   : > { %1144 = vmatpush1.msk.msra.mxu1 %vm198_vm1, %v192_v20 }
  0xa0   : > { %v277_v22 = vpop.permute.xlu0 %276  ;;  %v754_v23 = vpop.permute.xlu1 %753  ;;  %1145 = vmatmul.mubr.msk.f32.vlgmr.msra.gmra.mrb[0].mxu1 %vm194_vm3, %v1142_v21  ;;  %1155 = vmatprep.subr.msk.mxu1 %vm198_vm1, %v367_v6  ;;  %v148_v6 = vadd.s32 128, %v147_v5 }
  0xa1   : > { %v282_v24 = vsel %vm280_vm2, %v277_v22, %v279_v13  ;;  %v281_v25 = vsel %vm280_vm2, %v275_v14, %v277_v22  ;;  %1156 = vmatpush1.msk.msra.mxu1 %vm198_vm1, %v1394_v1  ;;  %545 = vmatprep.mubr.f32.mxu1 %v1312_v0 }
  0xa2   : > { %1146 = vmatprep.subr.msk.mxu0 %vm198_vm1, %v282_v24  ;;  %v160_v8 = vand.u32 15, %v148_v6 }
  0xa3   : > { %1147 = vmatpush1.msk.msra.mxu0 %vm198_vm1, %v281_v25 }
  0xa4   : > { %1148 = vmatmul.mubr.msk.f32.vlgmr.msra.gmra.mrb[0].mxu0 %vm194_vm3, %v179_v26  ;;  %v371_v28 = vpop.permute.xlu0 %370  ;;  %v752_v29 = vpop.permute.xlu1 %751  ;;  %1157 = vmatmul.mubr.msk.f32.vlgmr.msra.gmra.mrb[2].mxu1 %vm194_vm3, %v1154_v27  ;;  %vm174_vm11 = vcmp.ge.s32.totalorder %v160_v8, 1  ;;  %vm176_vm13 = vcmp.le.s32.totalorder %v160_v8, 14 }
  0xa5   : > { %v375_v30 = vsel %vm374_vm4, %v369_v17, %v371_v28  ;;  %v376_v31 = vsel %vm374_vm4, %v371_v28, %v373_v12  ;;  %448 = vmatprep.mubr.f32.mxu0 %v1312_v0  ;;  %635 = vmatprep.mubr.f32.mxu1 %v1312_v0  ;;  %v758_v36 = vsel %vm757_vm5, %v752_v29, %v754_v23 }
  0xa6   : > { %1150 = vmatprep.subr.msk.mxu0 %vm198_vm1, %v376_v31 }
  0xa7   : > { %1151 = vmatpush1.msk.msra.mxu0 %vm198_vm1, %v375_v30 }
  0xa8   : > { %v756_v32 = vpop.permute.xlu0 %755  ;;  %v560_v33 = vpop.permute.xlu1 %559 }
  0xa9   : > { %v759_v34 = vsel %vm757_vm5, %v754_v23, %v756_v32 }
  0xaa   : > { %1167 = vmatprep.subr.msk.mxu0 %vm198_vm1, %v759_v34 }
  0xac   : > { %1152 = vmatmul.mubr.msk.f32.vlgmr.msra.gmra.mrb[0].mxu0 %vm194_vm3, %v1149_v35  ;;  %v558_v37 = vpop.permute.xlu0 %557  ;;  %v844_v38 = vpop.permute.xlu1 %843 }
  0xad   : > { %1168 = vmatpush1.msk.msra.mxu0 %vm198_vm1, %v758_v36  ;;  %v563_v39 = vsel %vm561_vm6, %v558_v37, %v560_v33  ;;  %831 = vmatprep.mubr.f32.mxu0 %v1312_v0 }
  0xae   : > { %1158 = vmatprep.subr.msk.mxu1 %vm198_vm1, %v563_v39 }
  0xb0   : > { %v556_v41 = vpop.permute.xlu0 %555  ;;  %v842_v42 = vpop.permute.xlu1 %841  ;;  %1169 = vmatmul.mubr.msk.f32.vlgmr.msra.gmra.mrb[2].mxu0 %vm194_vm3, %v1166_v40 }
  0xb1   : > { %v562_v44 = vsel %vm561_vm6, %v556_v41, %v558_v37  ;;  %921 = vmatprep.mubr.f32.mxu0 %v1312_v0  ;;  %v848_v49 = vsel %vm847_vm7, %v842_v42, %v844_v38 }
  0xb2   : > { %1159 = vmatpush1.msk.msra.mxu1 %vm198_vm1, %v562_v44 }
  0xb3   : > { %1160 = vmatmul.mubr.msk.f32.vlgmr.msra.gmra.mrb[2].mxu1 %vm194_vm3, %v1153_v43 }
  0xb4   : > { %v846_v45 = vpop.permute.xlu0 %845  ;;  %v654_v46 = vpop.permute.xlu1 %653  ;;  %729 = vmatprep.mubr.f32.mxu1 %v1312_v0 }
  0xb5   : > { %v849_v47 = vsel %vm847_vm7, %v844_v38, %v846_v45 }
  0xb6   : > { %1170 = vmatprep.subr.msk.mxu0 %vm198_vm1, %v849_v47 }
  0xb7   : > { %1171 = vmatpush1.msk.msra.mxu0 %vm198_vm1, %v848_v49 }
  0xb8   : > { %v652_v50 = vpop.permute.xlu0 %651  ;;  %1172 = vmatmul.mubr.msk.f32.vlgmr.msra.gmra.mrb[2].mxu0 %vm194_vm3, %v1165_v48  ;;  %v938_v52 = vpop.permute.xlu1 %937 }
  0xb9   : > { %v657_v51 = vsel %vm655_vm8, %v652_v50, %v654_v46  ;;  %1015 = vmatprep.mubr.f32.mxu0 %v1312_v0 }
  0xba   : > { %1162 = vmatprep.subr.msk.mxu1 %vm198_vm1, %v657_v51 }
  0xbc   : > { %v650_v53 = vpop.permute.xlu0 %649  ;;  %v936_v56 = vpop.permute.xlu1 %935 }
  0xbd   : > { %v656_v55 = vsel %vm655_vm8, %v650_v53, %v652_v50  ;;  %v942_v60 = vsel %vm941_vm9, %v936_v56, %v938_v52 }
  0xbe   : > { %1163 = vmatpush1.msk.msra.mxu1 %vm198_vm1, %v656_v55 }
  0xbf   : > { %1164 = vmatmul.mubr.msk.f32.vlgmr.msra.gmra.mrb[2].mxu1 %vm194_vm3, %v1161_v54 }
  0xc0   : > { %v940_v57 = vpop.permute.xlu0 %939 }
  0xc1   : > { %v943_v58 = vsel %vm941_vm9, %v938_v52, %v940_v57 }
  0xc2   : > { %1174 = vmatprep.subr.msk.mxu0 %vm198_vm1, %v943_v58 }
  0xc3   : > { %1175 = vmatpush1.msk.msra.mxu0 %vm198_vm1, %v942_v60 }
  0xc4   : > { %1176 = vmatmul.mubr.msk.f32.vlgmr.msra.gmra.mrb[2].mxu0 %vm194_vm3, %v1173_v59 }
 0x173   : > { %v269_v61 = vpop.f32.mrb[0].mxu1 }
 0x174   : > { %v271_v62 = vpop.f32.mrb[1].mxu1 }
 0x17f   : > { %v450_v63 = vpop.f32.mrb[0].mxu0 }
 0x180   : > { %v1184_v0 = vadd.f32 %v450_v63, %v269_v61  ;;  %v452_v2 = vpop.f32.mrb[1].mxu0 }
 0x181   : > { %v1185_v4 = vadd.f32 %v452_v2, %v271_v62 }
 0x182   : > { %v461_v9 = vsel %vm173_vm10, %v1184_v0, 0.0 }
 0x183   : > { %v462_v12 = vsel %vm174_vm11, %v1185_v4, 0.0 }
 0x192   : > { %v731_v10 = vpop.f32.mrb[2].mxu1 }
 0x193   : > { %v738_v11 = vadd.f32 %v731_v10, %v461_v9  ;;  %v733_v13 = vpop.f32.mrb[3].mxu1 }
 0x194   : > { %v739_v14 = vadd.f32 %v733_v13, %v462_v12 }
 0x197   : > { %v1017_v15 = vpop.f32.mrb[2].mxu0 }
 0x198   : > { %v1028_v16 = vsel %vm175_vm12, %v1017_v15, 0.0  ;;  %v1019_v17 = vpop.f32.mrb[3].mxu0 }
 0x199   : > { %v1030_v18 = vadd.f32 %v1028_v16, %v738_v11  ;;  %v1029_v19 = vsel %vm176_vm13, %v1019_v17, 0.0 }
 0x19a   : > { %v1031_v20 = vadd.f32 %v1029_v19, %v739_v14 }
 0x19b   : > { %v1032_v21 = vsel %vm198_vm1, %v1030_v18, 0.0 }
 0x19c   : > { %v1033_v22 = vsel %vm198_vm1, %v1031_v20, 0.0 }
 0x19d   : > { %v1034_v23 = vadd.f32 %v1033_v22, %v1032_v21 }
 0x19f   : > { %1035 = vadd.xlane.f32.xlu0 %v1034_v23 }
 0x22c   : > { %v1036_v24 = vpop.xlane.xlu0 %1035 }
 0x22d   : > { %v1038_v25 = vmul.f32 0.00390625, %v1036_v24 }
 0x22f   : > { %v1039_v26 = vsub.f32 %v1030_v18, %v1038_v25  ;;  %v1040_v27 = vsub.f32 %v1031_v20, %v1038_v25 }
 0x231   : > { %v1041_v28 = vmul.f32 %v1039_v26, %v1039_v26  ;;  %v1042_v29 = vmul.f32 %v1040_v27, %v1040_v27 }
 0x233   : > { %v1043_v30 = vsel %vm198_vm1, %v1041_v28, 0.0  ;;  %v1044_v31 = vsel %vm198_vm1, %v1042_v29, 0.0 }
 0x234   : > { %v1045_v32 = vadd.f32 %v1044_v31, %v1043_v30 }
 0x236   : > { %1046 = vadd.xlane.f32.xlu1 %v1045_v32 }
 0x2c3   : > { %v1047_v33 = vpop.xlane.xlu1 %1046 }
 0x2c4   : > { %v1048_v34 = vmul.f32 0.00390625, %v1047_v33 }
 0x2c6   : > { %v1049_v35 = vadd.f32 1e-05, %v1048_v34 }
 0x2c8   : > { %1246 = vrsqrt.f32 %v1049_v35 }
 0x2d2   : > { %v1247_v36 = vpop.eup %1246 }
 0x2d3   : > { %v1051_v37 = vmul.f32 %v1247_v36, %v1039_v26  ;;  %v1052_v38 = vmul.f32 %v1247_v36, %v1040_v27 }
 0x2d5   : > { %v1053_v39 = vmax.f32 %v1051_v37, 0.0  ;;  %v1054_v40 = vmax.f32 %v1052_v38, 0.0 }
 0x2d7   : > { %v1057_v41 = vcombine.low %v1053_v39, %v1054_v40 }
 0x2d9   : > { %v1059_v42 = vadd.f32 %v1057_v41, %v1394_v1 }
 0x2db   : > { %1060 = vst [vmem:[%s136_s8] sm:$0xff] %v1059_v42 }
 0x2dc   : > { %1261 = shalt.err (!%p1258_p3)
}
 0x2dd   : > { %s1262_s26 = scalar_lea.hbm %s1475_s21, 128  ;;  %s1266_s29 = scalar_lea.hbm %s1519_s2, 256 }
 0x2de   : > { %p1263_p4 = scmp.ne.s32.totalorder %s1475_s21, %s1262_s26  ;;  %p1267_p9 = scmp.lt.u32.totalorder %s1475_s21, %s1519_s2 }
 0x2df   : > { %p1268_p10 = scmp.lt.u32.totalorder %s1266_s29, %s1262_s26  ;;  %p1270_p12 = scmp.lt.u32.totalorder %s1262_s26, %s1475_s21 }
 0x2e0   : > { %p1264_p7 = pnand %p1263_p4, %p1375_p5 }
 0x2e1   : > { %p1269_p11 = por %p1268_p10, %p1267_p9 }
 0x2e2   : > { %p1265_p8 = pneg %p1264_p7 }
 0x2e3   : > { %p1271_p13 = por %p1270_p12, %p1269_p11 }
 0x2e5   : > { %p1272_p0 = pnand %p1271_p13, %p1265_p8 }
 0x2e7   : > { %1275 = shalt.err (!%p1272_p0)
}
 0x2e8   : > { %1196 = dma.vmem_to_hbm [thread:$0]  (%p1375_p5), %s1477_s14, 128, %s1475_s21, %s1062_s22  }
 0x2e9 PF: > { %p1202_p1 = scmp.ge.s32.totalorder %s1310_s12, 2  ;;  %s1088_s4 = sand.u32 1, %s1298_s9  }
 0x2ea   : > { %s1089_s5 = scalar_lea.sflag [#allocation4], %s1088_s4 }
 0x2eb   : > { %p1199_p2 = pnand %p1202_p1, %p1379_p6 }
 0x2ed   : > { %1293 = dma.done.wait (!%p1199_p2), %s1089_s5, 128  }
 0x2ee   : > { %1295 = vsyncadd (!%p1199_p2), %s1089_s5, 4294967168  ;;  %p12_p3 = scmp.ge.s32.totalorder %s1362_s15, 4   ;;  %s1522_s9 = smov %s1302_s10 }
 0x2ef   : > { %s1523_s10 = smov %s1306_s11  ;;  %s1524_s11 = smov %s1373_s18 }
 0x2f0   : > { %s1525_s12 = smov %s1362_s15  ;;  %14 = sbr.rel (!%p12_p3) target bundleno = 3 (0x3), region = 71 }
 0x2f7   :  { %1094 = vsyncpa [#allocation4], 1 }
 0x2f8   :  { %1096 = vsyncpa [#allocation4 + $0x1], 1 }

</bundles_post_ra>
